<compile_context>
chip_gen: v7x
topology: tpu7x:2x2x1
jax: 0.10.0
libtpu: 0.0.40
codegen_flags: <defaults>
</compile_context>

<pallas_src>
import functools

import jax
import jax.numpy as jnp
from jax.experimental import pallas as pl
from jax.experimental.pallas import tpu as pltpu


def _rmsnorm_kernel(x_ref, w_ref, o_ref, *, eps, inv_hidden):
    # x_ref: (rows_tile, hidden), w_ref: (1, hidden), o_ref: (rows_tile, hidden)
    x = x_ref[...]
    input_dtype = x.dtype

    # hidden_states.to(torch.float32); variance = mean(x^2, -1, keepdims=True)
    xf = x.astype(jnp.float32)
    variance = jnp.sum(xf * xf, axis=-1, keepdims=True) * inv_hidden

    # x * rsqrt(variance + eps)  (rsqrt rides the EUP slot, effectively free),
    # cast back to input dtype, then weight multiply (PyTorch order).
    scale = jax.lax.rsqrt(variance + eps)
    normed = (xf * scale).astype(input_dtype)

    w = w_ref[...]
    if w.dtype == input_dtype:
        # Common production case: stay in the activation dtype, no converts.
        o_ref[...] = w * normed
    else:
        # Mixed dtypes (e.g. f32 weight, bf16 activations): promote, multiply,
        # cast back to the activation dtype (matches the reference).
        o_ref[...] = (w * normed).astype(o_ref.dtype)


def _cdiv(a, b):
    return (a + b - 1) // b


def _round_up(x, m):
    return ((x + m - 1) // m) * m


def _pick_tile_and_vmem(rows, hidden, dtype):
    """Choose a rows tile and a VMEM limit per TPU generation."""
    itemsize = jnp.dtype(dtype).itemsize
    sublane = max(8, 32 // itemsize)  # 8 for f32, 16 for bf16

    vmem_cap = 64 << 20  # conservative fallback (v7x per-TC VMEM)
    num_tc = 1
    try:
        vmem_cap = int(pltpu.get_tpu_info().vmem_capacity_bytes)
        # v7x exposes 64 MiB of VMEM per TensorCore and has 2 TCs/chip;
        # v5e/v6e report 128 MiB and have a single TC.
        num_tc = 2 if vmem_cap <= (64 << 20) else 1
    except Exception:
        pass

    # Per-row VMEM footprint: double-buffered input + double-buffered output
    # (input dtype) plus f32 intermediates (xf, xf*xf / normed) live in body.
    per_row = hidden * (4 * itemsize + 12)
    budget = vmem_cap // 3

    # Target a multi-MiB input block (amortizes per-step overhead); for small
    # hidden this pushes well past 1024 rows, bounded by the VMEM budget.
    rows_cap = max(1024, (4 << 20) // max(1, hidden * itemsize))
    max_rows_vmem = budget // max(1, per_row)
    rows_tile = max(sublane, min(rows_cap, max_rows_vmem))
    rows_tile = max(sublane, (rows_tile // sublane) * sublane)
    # Never larger than the (sublane-rounded) problem.
    rows_tile = min(rows_tile, _round_up(rows, sublane))

    # On 2-TensorCore chips (v7x), prefer small grids that are a multiple of
    # the TC count so dimension_semantics=("parallel",) keeps both cores busy.
    if num_tc >= 2 and rows > sublane:
        grid = _cdiv(rows, rows_tile)
        if grid % num_tc != 0 and grid <= 4 * num_tc:
            target = _round_up(grid, num_tc)
            rows_tile = max(sublane, _round_up(_cdiv(rows, target), sublane))

    needed = (
        4 * rows_tile * hidden * itemsize   # double-buffered in + out tiles
        + 3 * rows_tile * hidden * 4        # f32 intermediates
        + 8 * hidden * 4                    # weight buffers + slack
    )
    vmem_limit = min(vmem_cap, max(32 << 20, needed + (8 << 20)))
    return rows_tile, int(vmem_limit)


def llama_rmsnorm(hidden_states, weight, eps=1e-6, rows_tile=None):
    """hidden_states: (..., hidden); weight: (hidden,)."""
    orig_shape = hidden_states.shape
    hidden = orig_shape[-1]
    x2d = hidden_states.reshape(-1, hidden)
    rows = x2d.shape[0]
    dtype = hidden_states.dtype

    auto_tile, vmem_limit = _pick_tile_and_vmem(rows, hidden, dtype)
    if rows_tile is None:
        rows_tile = auto_tile

    # Ragged rows: let Pallas handle the trailing partial block (masked store),
    # no extra pad/slice HBM round trips.
    grid = _cdiv(rows, rows_tile)

    w2d = weight.reshape(1, hidden)
    itemsize = jnp.dtype(dtype).itemsize

    cost = pl.CostEstimate(
        flops=4 * rows * hidden,
        transcendentals=rows,
        bytes_accessed=2 * rows * hidden * itemsize
        + hidden * jnp.dtype(weight.dtype).itemsize,
    )

    out = pl.pallas_call(
        functools.partial(_rmsnorm_kernel, eps=eps, inv_hidden=1.0 / hidden),
        out_shape=jax.ShapeDtypeStruct((rows, hidden), dtype),
        grid_spec=pltpu.PrefetchScalarGridSpec(
            num_scalar_prefetch=0,
            grid=(grid,),
            in_specs=[
                pl.BlockSpec((rows_tile, hidden), lambda i: (i, 0)),
                pl.BlockSpec((1, hidden), lambda i: (0, 0)),
            ],
            out_specs=pl.BlockSpec((rows_tile, hidden), lambda i: (i, 0)),
        ),
        compiler_params=pltpu.CompilerParams(
            dimension_semantics=("parallel",),
            vmem_limit_bytes=vmem_limit,
        ),
        cost_estimate=cost,
    )(x2d, w2d)

    return out.reshape(orig_shape)


def llama_rmsnorm_ref(hidden_states, weight, eps=1e-6):
    """Pure-JAX reference mirroring the PyTorch forward."""
    input_dtype = hidden_states.dtype
    xf = hidden_states.astype(jnp.float32)
    variance = jnp.mean(xf * xf, axis=-1, keepdims=True)
    normed = xf * jax.lax.rsqrt(variance + eps)
    return (weight * normed.astype(input_dtype)).astype(input_dtype)


if __name__ == "__main__":
    key = jax.random.PRNGKey(0)

    # Case 1: small canonical shape (f32), unit weight.
    batch, seq, hidden = 2, 8, 128
    x = jax.random.normal(key, (batch, seq, hidden), dtype=jnp.float32)
    weight = jnp.ones((hidden,), dtype=jnp.float32)  # nn.Parameter(torch.ones(...))
    out = jax.block_until_ready(llama_rmsnorm(x, weight, eps=1e-6))
    ref = llama_rmsnorm_ref(x, weight, eps=1e-6)
    assert out.shape == x.shape and out.dtype == x.dtype
    assert jnp.allclose(out, ref, atol=1e-5, rtol=1e-5)

    # Case 2: mixed dtypes (bf16 activations, f32 weight), ragged row count.
    k2 = jax.random.PRNGKey(1)
    x2 = jax.random.normal(k2, (3, 5, 256), dtype=jnp.bfloat16)
    w2 = (1.0 + 0.1 * jax.random.normal(jax.random.PRNGKey(2), (256,))).astype(
        jnp.float32
    )
    out2 = jax.block_until_ready(llama_rmsnorm(x2, w2, eps=1e-6))
    ref2 = llama_rmsnorm_ref(x2, w2, eps=1e-6)
    assert out2.shape == x2.shape and out2.dtype == x2.dtype
    assert jnp.allclose(
        out2.astype(jnp.float32), ref2.astype(jnp.float32), atol=2e-2, rtol=2e-2
    )

    # Case 3: rows not a multiple of the sublane (exercises the masked
    # trailing partial block path, f32, non-trivial weight).
    k3 = jax.random.PRNGKey(3)
    x3 = jax.random.normal(k3, (1, 13, 128), dtype=jnp.float32)
    w3 = (1.0 + 0.05 * jax.random.normal(jax.random.PRNGKey(4), (128,))).astype(
        jnp.float32
    )
    out3 = jax.block_until_ready(llama_rmsnorm(x3, w3, eps=1e-6))
    ref3 = llama_rmsnorm_ref(x3, w3, eps=1e-6)
    assert out3.shape == x3.shape and out3.dtype == x3.dtype
    assert jnp.allclose(out3, ref3, atol=1e-5, rtol=1e-5)

    print("KERNEL_OK")
</pallas_src>

<mosaic_0001>
module attributes {stable_mosaic.version = 11 : i64} {
  func.func @_rmsnorm_kernel(%arg0: i32, %arg1: memref<16x128xf32, #tpu.memory_space<vmem>>, %arg2: memref<1x128xf32, #tpu.memory_space<vmem>>, %arg3: memref<16x128xf32, #tpu.memory_space<vmem>>) attributes {dimension_semantics = [#tpu.dimension_semantics<parallel>], iteration_bounds = array<i64: 1>, scalar_prefetch = 0 : i64, scratch_operands = 0 : i64, tpu.core_type = #tpu.core_type<tc>, window_params = [{transform_indices = @transform_0, window_bounds = array<i64: 16, 128>}, {pipeline_mode = #tpu.pipeline_mode<synchronous>, transform_indices = @transform_1, window_bounds = array<i64: 1, 128>}, {transform_indices = @transform_2, window_bounds = array<i64: 16, 128>}]} {
    %c0 = arith.constant 0 : index
    %c0_0 = arith.constant 0 : index
    %0 = vector.load %arg1[%c0, %c0_0] : memref<16x128xf32, #tpu.memory_space<vmem>>, vector<16x128xf32>
    %1 = arith.mulf %0, %0 : vector<16x128xf32>
    %cst = arith.constant dense<0.000000e+00> : vector<16xf32>
    %2 = vector.multi_reduction <add>, %1, %cst [1] : vector<16x128xf32> to vector<16xf32>
    %3 = vector.shape_cast %2 : vector<16xf32> to vector<16x1xf32>
    %cst_1 = arith.constant 7.812500e-03 : f32
    %4 = vector.broadcast %cst_1 : f32 to vector<16x1xf32>
    %5 = arith.mulf %3, %4 : vector<16x1xf32>
    %cst_2 = arith.constant 9.99999997E-7 : f32
    %6 = vector.broadcast %cst_2 : f32 to vector<16x1xf32>
    %7 = arith.addf %5, %6 : vector<16x1xf32>
    %8 = math.rsqrt %7 : vector<16x1xf32>
    %9 = vector.broadcast %8 : vector<16x1xf32> to vector<16x128xf32>
    %10 = arith.mulf %0, %9 : vector<16x128xf32>
    %c0_3 = arith.constant 0 : index
    %c0_4 = arith.constant 0 : index
    %11 = vector.load %arg2[%c0_3, %c0_4] : memref<1x128xf32, #tpu.memory_space<vmem>>, vector<1x128xf32>
    %12 = vector.broadcast %11 : vector<1x128xf32> to vector<16x128xf32>
    %13 = arith.mulf %12, %10 : vector<16x128xf32>
    %c0_5 = arith.constant 0 : index
    %c0_6 = arith.constant 0 : index
    %14 = vector.load %arg3[%c0_5, %c0_6] : memref<16x128xf32, #tpu.memory_space<vmem>>, vector<16x128xf32>
    tpu.vector_store %arg3[%c0_5, %c0_6], %13 {strides = array<i32>} : memref<16x128xf32, #tpu.memory_space<vmem>>, vector<16x128xf32>,
    return
  }
  func.func @transform_0(%arg0: i32) -> (i32, i32) {
    %c0_i32 = arith.constant 0 : i32
    %c0_i32_0 = arith.constant 0 : i32
    return %arg0, %c0_i32 : i32, i32
  }
  func.func @transform_1(%arg0: i32) -> (i32, i32) {
    %c0_i32 = arith.constant 0 : i32
    %c0_i32_0 = arith.constant 0 : i32
    %c0_i32_1 = arith.constant 0 : i32
    return %c0_i32, %c0_i32_0 : i32, i32
  }
  func.func @transform_2(%arg0: i32) -> (i32, i32) {
    %c0_i32 = arith.constant 0 : i32
    %c0_i32_0 = arith.constant 0 : i32
    return %arg0, %c0_i32 : i32, i32
  }
}

</mosaic_0001>

<bundles_post_ra>
// kernel: tpu_custom_call.1
= control target key start
LH: loop header
LB: loop body
LE: loop exit
PB: predicated region body
PF: predicated region fallthrough
CT: control target
= control target key end

     0   :  { %7 = vsyncpa [#allocation3], 0  ;;  %s179_s0 = inlined_call_operand.hbm [shape: f32[16,128], index: 0, kind: input, shape index: {}]   ;;  %s180_s1 = inlined_call_operand.vmem [shape: f32[1,128], index: 1, kind: input, shape index: {}]   ;;  %s181_s2 = inlined_call_operand.hbm [shape: f32[16,128], index: 2, kind: output, shape index: {}]  }
   0x1   :  { %8 = vsyncpa [#allocation4], 0  ;;  %s127_s9 = smov [#allocation2]   ;;  %s79_s13 = scalar_lea.hbm %s179_s0, 256 }
   0x2   :  { %s14_s10 = sshll.u32 %s127_s9, 4  ;;  %p80_p0 = scmp.ne.s32.totalorder %s179_s0, %s79_s13  ;;  %s15_s10 = int_to_ptr.vmem [resolvable:$true] %s14_s10 }
   0x3   :  { %p83_p1 = scmp.lt.u32.totalorder %s79_s13, %s179_s0 }
   0x5   :  { %p85_p2 = pnand %p83_p1, %p80_p0 }
   0x7   :  { %88 = shalt.err (!%p85_p2)
}
   0x8   :  { %s89_s18 = scalar_lea.vmem %s15_s10, 256  ;;  %p94_p4 = scmp.lt.s32.totalorder %s15_s10, %s15_s10 }
   0x9   :  { %p90_p3 = scmp.ne.s32.totalorder %s15_s10, %s89_s18  ;;  %p95_p5 = scmp.lt.s32.totalorder %s89_s18, %s89_s18 }
   0xb   :  { %p96_p6 = por %p95_p5, %p94_p4 }
   0xd   :  { %p97_p7 = pnand %p96_p6, %p90_p3 }
   0xf   :  { %100 = shalt.err (!%p97_p7)
}
  0x10   :  { %s128_s19 = smov 128   ;;  %s129_s20 = smov 8  }
  0x11   :  { %20 = dma.hbm_to_vmem [thread:$0]  %s179_s0, 256, %s15_s10, [#allocation3], %s128_s19, %s128_s19, %s129_s20  }
  0x12   :  { %123 = dma.done.wait [#allocation3], 256  }
  0x13   :  { %124 = vsyncadd [#allocation3], 4294967040  ;;  %v26_v0 = vld [vmem:[#allocation2] sm:$0xff]  ;;  %v27_v1 = vld [vmem:[#allocation2 + $0x8] sm:$0xff]  ;;  %s130_s0 = smov [#allocation5]  }
  0x14   :  { %v28_v2 = vmul.f32 %v26_v0, %v26_v0  ;;  %v29_v3 = vmul.f32 %v27_v1, %v27_v1  ;;  %v70_v11 = vld [vmem:[%s180_s1] ss:$0 sm:$0xff]  ;;  %s58_s25 = sshll.u32 %s130_s0, 4  ;;  %s59_s25 = int_to_ptr.vmem [resolvable:$true] %s58_s25 }
  0x15   :  { %s101_s26 = scalar_lea.vmem %s59_s25, 256  ;;  %p106_p9 = scmp.lt.s32.totalorder %s59_s25, %s59_s25 }
  0x16   :  { %30 = vadd.xlane.f32.xlu0 %v28_v2  ;;  %p102_p8 = scmp.ne.s32.totalorder %s59_s25, %s101_s26  ;;  %p107_p10 = scmp.lt.s32.totalorder %s101_s26, %s101_s26 }
  0x18   :  { %p108_p11 = por %p107_p10, %p106_p9 }
  0x1a   :  { %32 = vadd.xlane.f32.xlu0 %v29_v3  ;;  %p109_p12 = pnand %p108_p11, %p102_p8 }
  0xa3   :  { %v31_v4 = vpop.xlane.xlu0 %30 }
  0xa4   :  { %v34_v5 = vmul.f32 0.0078125, %v31_v4 }
  0xa6   :  { %v36_v6 = vadd.f32 1e-06, %v34_v5 }
  0xa7   :  { %v33_v7 = vpop.xlane.xlu0 %32 }
  0xa8   :  { %75 = vrsqrt.f32 %v36_v6  ;;  %v35_v8 = vmul.f32 0.0078125, %v33_v7 }
  0xaa   :  { %v37_v9 = vadd.f32 1e-06, %v35_v8 }
  0xac   :  { %77 = vrsqrt.f32 %v37_v9 }
  0xb2   :  { %v76_v10 = vpop.eup %75 }
  0xb3   :  { %v40_v12 = vmul.f32 %v76_v10, %v26_v0 }
  0xb5   :  { %v49_v13 = vmul.f32 %v70_v11, %v40_v12 }
  0xb6   :  { %v78_v14 = vpop.eup %77 }
  0xb7   :  { %v41_v15 = vmul.f32 %v78_v14, %v27_v1  ;;  %51 = vst [vmem:[#allocation5] sm:$0xff] %v49_v13 }
  0xb9   :  { %v50_v16 = vmul.f32 %v70_v11, %v41_v15 }
  0xbb   :  { %52 = vst [vmem:[#allocation5 + $0x8] sm:$0xff] %v50_v16 }
  0xbc   :  { %112 = shalt.err (!%p109_p12)
}
  0xbd   :  { %s113_s1 = scalar_lea.hbm %s181_s2, 256 }
  0xbe   :  { %p114_p13 = scmp.ne.s32.totalorder %s181_s2, %s113_s1  ;;  %p117_p0 = scmp.lt.u32.totalorder %s113_s1, %s181_s2 }
  0xc0   :  { %p119_p1 = pnand %p117_p0, %p114_p13 }
  0xc2   :  { %122 = shalt.err (!%p119_p1)
}
  0xc3   :  { %64 = dma.vmem_to_hbm [thread:$0]  %s59_s25, 256, %s181_s2, [#allocation4], %s128_s19, %s128_s19, %s129_s20  }
  0xc4   :  { %125 = dma.done.wait [#allocation4], 256  }
  0xc5   :  { %126 = vsyncadd [#allocation4], 4294967040 }
  0xc6   :  { %68 = vsyncpa [#allocation3], 1 }
  0xc7   :  { %69 = vsyncpa [#allocation4], 1 }

</bundles_post_ra>
